<compile_context>
chip_gen: v7x
topology: tpu7x:2x2x1
jax: 0.10.0
libtpu: 0.0.40
codegen_flags: <defaults>
</compile_context>

<pallas_src>
import jax
import jax.numpy as jnp
from jax.experimental import pallas as pl
from jax.experimental.pallas import tpu as pltpu

_LANES = 512            # lane-dense last dim (multiple of 128) -> unmasked vst
_MAX_BLOCK_ROWS = 512   # 512 x 512 f32 = 1 MiB per operand tile
_PALLAS_MIN_N = 1024    # below this, per-step (~0.35us) + launch overhead dominates


def _round_up(a: int, b: int) -> int:
    return (a + b - 1) // b * b


def logistic_kernel(params_ref, x_ref, y_ref, o_ref):
    # params_ref: SMEM (2,) f32 [theta_0, theta_1]
    # x_ref, y_ref, o_ref: VMEM (block_rows, _LANES) tiles
    theta_0 = params_ref[0]
    c = theta_0 * params_ref[1]                      # scalar unit, free
    # theta_0*x*(1 - theta_1*y) == x*(theta_0 - c*y): 3 VPU ops per element
    o_ref[...] = x_ref[...] * (theta_0 - c * y_ref[...])


def _logistic_pallas(params: jax.Array, x: jax.Array, y: jax.Array) -> jax.Array:
    n = x.shape[0]
    rows = pl.cdiv(n, _LANES)
    block_rows = min(_MAX_BLOCK_ROWS, _round_up(rows, 8))   # multiple of 8 (sublanes)
    rows_pad = _round_up(rows, block_rows)
    n_pad = rows_pad * _LANES
    num_blocks = rows_pad // block_rows

    # Pad up to a whole number of tiles; padded lanes are never returned.
    x2 = jnp.pad(x, (0, n_pad - n)).reshape(rows_pad, _LANES)
    y2 = jnp.pad(y, (0, n_pad - n)).reshape(rows_pad, _LANES)

    out2 = pl.pallas_call(
        logistic_kernel,
        out_shape=jax.ShapeDtypeStruct((rows_pad, _LANES), jnp.float32),
        grid=(num_blocks,),
        in_specs=[
            pl.BlockSpec(memory_space=pltpu.SMEM),                 # params (scalars)
            pl.BlockSpec((block_rows, _LANES), lambda i: (i, 0)),  # x tile
            pl.BlockSpec((block_rows, _LANES), lambda i: (i, 0)),  # y tile
        ],
        out_specs=pl.BlockSpec((block_rows, _LANES), lambda i: (i, 0)),
        compiler_params=pltpu.CompilerParams(
            dimension_semantics=("parallel",)),  # v7x: 2 TCs split the grid
    )(params, x2, y2)

    return out2.reshape(-1)[:n]


def logistic_model(params: jax.Array, x: jax.Array, y: jax.Array,
                   t: jax.Array) -> jax.Array:
    """Pallas equivalent of Logistic_Model.forward.

    params: (2,) float32 [theta_0, theta_1]
    x, y:   (N,) float32
    t:      single-element array (unused by the math, kept for signature parity)
    """
    assert x.ndim == 1 and y.ndim == 1
    assert x.shape == y.shape
    assert t.size == 1
    params = params.astype(jnp.float32)
    x = x.astype(jnp.float32)
    y = y.astype(jnp.float32)
    n = x.shape[0]
    if n < _PALLAS_MIN_N:
        # Tiny problem: fused XLA elementwise beats any Pallas launch.
        return params[0] * x * (1.0 - params[1] * y)
    return _logistic_pallas(params, x, y)


if __name__ == "__main__":
    # Deterministic parameter init (mirrors __init__ defaults theta_0=theta_1=2.0)
    params = jnp.array([2.0, 2.0], dtype=jnp.float32)
    t = jnp.array([0.0], dtype=jnp.float32)
    key = jax.random.PRNGKey(0)

    def reference(p, x, y):
        return p[0] * x * (1.0 - p[1] * y)

    # N = 8      -> tiny-size fallback path (matches the module's typical use)
    # N = 5000   -> Pallas path, single grid step, exercises padding (5000 % 512 != 0)
    # N = 300000 -> Pallas path, multi-step parallel grid
    for i, n in enumerate((8, 5000, 300_000)):
        kx, ky = jax.random.split(jax.random.fold_in(key, i))
        x = jax.random.uniform(kx, (n,), dtype=jnp.float32)
        y = jax.random.uniform(ky, (n,), dtype=jnp.float32)

        out = logistic_model(params, x, y, t)
        jax.block_until_ready(out)

        expected = reference(params, x, y)
        assert out.shape == (n,), (out.shape, n)
        assert jnp.allclose(out, expected, atol=1e-6, rtol=1e-6), (
            f"mismatch at N={n}")

    print("KERNEL_OK")
</pallas_src>

<mosaic_0001>
module attributes {stable_mosaic.version = 11 : i64} {
  func.func @logistic_kernel(%arg0: i32, %arg1: memref<2xf32, #tpu.memory_space<smem>>, %arg2: memref<16x512xf32, #tpu.memory_space<vmem>>, %arg3: memref<16x512xf32, #tpu.memory_space<vmem>>, %arg4: memref<16x512xf32, #tpu.memory_space<vmem>>) attributes {dimension_semantics = [#tpu.dimension_semantics<parallel>], iteration_bounds = array<i64: 1>, scalar_prefetch = 0 : i64, scratch_operands = 0 : i64, tpu.core_type = #tpu.core_type<tc>, window_params = [{transform_indices = @transform_0, window_bounds = array<i64: 2>}, {transform_indices = @transform_1, window_bounds = array<i64: 16, 512>}, {transform_indices = @transform_2, window_bounds = array<i64: 16, 512>}, {transform_indices = @transform_3, window_bounds = array<i64: 16, 512>}]} {
    %c0 = arith.constant 0 : index
    %0 = memref.load %arg1[%c0] : memref<2xf32, #tpu.memory_space<smem>>
    %c1 = arith.constant 1 : index
    %1 = memref.load %arg1[%c1] : memref<2xf32, #tpu.memory_space<smem>>
    %2 = arith.mulf %0, %1 : f32
    %c0_0 = arith.constant 0 : index
    %c0_1 = arith.constant 0 : index
    %3 = vector.load %arg2[%c0_0, %c0_1] : memref<16x512xf32, #tpu.memory_space<vmem>>, vector<16x512xf32>
    %c0_2 = arith.constant 0 : index
    %c0_3 = arith.constant 0 : index
    %4 = vector.load %arg3[%c0_2, %c0_3] : memref<16x512xf32, #tpu.memory_space<vmem>>, vector<16x512xf32>
    %5 = vector.broadcast %2 : f32 to vector<16x512xf32>
    %6 = arith.mulf %5, %4 : vector<16x512xf32>
    %7 = vector.broadcast %0 : f32 to vector<16x512xf32>
    %8 = arith.subf %7, %6 : vector<16x512xf32>
    %9 = arith.mulf %3, %8 : vector<16x512xf32>
    %c0_4 = arith.constant 0 : index
    %c0_5 = arith.constant 0 : index
    %10 = vector.load %arg4[%c0_4, %c0_5] : memref<16x512xf32, #tpu.memory_space<vmem>>, vector<16x512xf32>
    tpu.vector_store %arg4[%c0_4, %c0_5], %9 {strides = array<i32>} : memref<16x512xf32, #tpu.memory_space<vmem>>, vector<16x512xf32>,
    return
  }
  func.func @transform_0(%arg0: i32) -> i32 {
    %c0_i32 = arith.constant 0 : i32
    %c0_i32_0 = arith.constant 0 : i32
    return %c0_i32 : i32
  }
  func.func @transform_1(%arg0: i32) -> (i32, i32) {
    %c0_i32 = arith.constant 0 : i32
    %c0_i32_0 = arith.constant 0 : i32
    return %arg0, %c0_i32 : i32, i32
  }
  func.func @transform_2(%arg0: i32) -> (i32, i32) {
    %c0_i32 = arith.constant 0 : i32
    %c0_i32_0 = arith.constant 0 : i32
    return %arg0, %c0_i32 : i32, i32
  }
  func.func @transform_3(%arg0: i32) -> (i32, i32) {
    %c0_i32 = arith.constant 0 : i32
    %c0_i32_0 = arith.constant 0 : i32
    return %arg0, %c0_i32 : i32, i32
  }
}

</mosaic_0001>

<bundles_post_ra>
// kernel: tpu_custom_call.1
= control target key start
LH: loop header
LB: loop body
LE: loop exit
PB: predicated region body
PF: predicated region fallthrough
CT: control target
= control target key end

     0   :  { %8 = vsyncpa [#allocation5], 0  ;;  %s300_s0 = inlined_call_operand.hbm [shape: f32[2], index: 0, kind: input, shape index: {}]   ;;  %s301_s1 = inlined_call_operand.hbm [shape: f32[16,512], index: 1, kind: input, shape index: {}]   ;;  %s302_s2 = inlined_call_operand.hbm [shape: f32[16,512], index: 2, kind: input, shape index: {}]   ;;  %s303_s3 = inlined_call_operand.hbm [shape: f32[16,512], index: 3, kind: output, shape index: {}]  }
   0x1   :  { %9 = vsyncpa [#allocation3], 0 }
   0x2   :  { %10 = vsyncpa [#allocation8], 0 }
   0x3   :  { %11 = vsyncpa [#allocation4], 0  ;;  %s133_s14 = scalar_lea.hbm %s300_s0, 16 }
   0x4   :  { %p134_p0 = scmp.ne.s32.totalorder %s300_s0, %s133_s14  ;;  %p137_p1 = scmp.lt.u32.totalorder %s133_s14, %s300_s0 }
   0x6   :  { %p139_p2 = pnand %p137_p1, %p134_p0 }
   0x8   :  { %142 = shalt.err (!%p139_p2)
}
   0x9   :  { %s217_s19 = smov [#allocation2]   ;;  %s218_s22 = smov [#allocation6]  }
   0xa   :  { %19 = dma.hbm_to_smem %s300_s0, 16, %s217_s19, [#allocation5]  }
   0xb   :  { %s25_s23 = sshll.u32 %s218_s22, 4  ;;  %s143_s26 = scalar_lea.hbm %s301_s1, 1024  ;;  %s26_s23 = int_to_ptr.vmem [resolvable:$true] %s25_s23 }
   0xc   :  { %p144_p3 = scmp.ne.s32.totalorder %s301_s1, %s143_s26  ;;  %p147_p4 = scmp.lt.u32.totalorder %s143_s26, %s301_s1 }
   0xe   :  { %p149_p5 = pnand %p147_p4, %p144_p3 }
  0x10   :  { %152 = shalt.err (!%p149_p5)
}
  0x11   :  { %s153_s4 = scalar_lea.vmem %s26_s23, 1024  ;;  %p158_p7 = scmp.lt.s32.totalorder %s26_s23, %s26_s23 }
  0x12   :  { %p154_p6 = scmp.ne.s32.totalorder %s26_s23, %s153_s4  ;;  %p159_p8 = scmp.lt.s32.totalorder %s153_s4, %s153_s4 }
  0x14   :  { %p160_p9 = por %p159_p8, %p158_p7 }
  0x16   :  { %p161_p10 = pnand %p160_p9, %p154_p6 }
  0x18   :  { %164 = shalt.err (!%p161_p10)
}
  0x19   :  { %s219_s0 = smov 512   ;;  %s220_s5 = smov 32  }
  0x1a   :  { %31 = dma.hbm_to_vmem [thread:$0]  %s301_s1, 1024, %s26_s23, [#allocation3], %s219_s0, %s219_s0, %s220_s5  }
  0x1b   :  { %s221_s8 = smov [#allocation7]   ;;  %s165_s12 = scalar_lea.hbm %s302_s2, 1024 }
  0x1c   :  { %s37_s9 = sshll.u32 %s221_s8, 4  ;;  %p166_p11 = scmp.ne.s32.totalorder %s302_s2, %s165_s12  ;;  %s38_s9 = int_to_ptr.vmem [resolvable:$true] %s37_s9 }
  0x1d   :  { %p169_p12 = scmp.lt.u32.totalorder %s165_s12, %s302_s2 }
  0x1f   :  { %p171_p13 = pnand %p169_p12, %p166_p11 }
  0x21   :  { %174 = shalt.err (!%p171_p13)
}
  0x22   :  { %s175_s17 = scalar_lea.vmem %s38_s9, 1024  ;;  %p180_p1 = scmp.lt.s32.totalorder %s38_s9, %s38_s9 }
  0x23   :  { %p176_p0 = scmp.ne.s32.totalorder %s38_s9, %s175_s17  ;;  %p181_p2 = scmp.lt.s32.totalorder %s175_s17, %s175_s17 }
  0x25   :  { %p182_p3 = por %p181_p2, %p180_p1 }
  0x27   :  { %p183_p4 = pnand %p182_p3, %p176_p0 }
  0x29   :  { %186 = shalt.err (!%p183_p4)
}
  0x2a   :  { %43 = dma.hbm_to_vmem [thread:$0]  %s302_s2, 1024, %s38_s9, [#allocation8], %s219_s0, %s219_s0, %s220_s5  }
  0x2b   :  { %209 = dma.done.wait [#allocation5], 16  }
  0x2c   :  { %210 = vsyncadd [#allocation5], 4294967280 }
  0x2d   :  { %211 = dma.done.wait [#allocation3], 1024  }
  0x2e   :  { %212 = vsyncadd [#allocation3], 4294966272 }
  0x2f   :  { %213 = dma.done.wait [#allocation8], 1024  }
  0x30   :  { %214 = vsyncadd [#allocation8], 4294966272 }
  0x31   :  { %53 = sfence }
  0x32   :  { %s54_s19 = sld [smem:[#allocation2]]  ;;  %s126_s20 = sld [smem:[#allocation2 + $0x1]]  ;;  %v65_v0 = vld [vmem:[#allocation7] sm:$0xff]  ;;  %v66_v1 = vld [vmem:[#allocation7 + $0x8] sm:$0xff]  ;;  %v67_v2 = vld [vmem:[#allocation7 + $0x10] sm:$0xff] }
  0x33   :  { %v68_v3 = vld [vmem:[#allocation7 + $0x18] sm:$0xff]  ;;  %v69_v4 = vld [vmem:[#allocation7 + $0x20] sm:$0xff]  ;;  %v70_v5 = vld [vmem:[#allocation7 + $0x28] sm:$0xff]  ;;  %s222_s2 = smov [#allocation9]  }
  0x34   :  { %v71_v6 = vld [vmem:[#allocation7 + $0x30] sm:$0xff]  ;;  %v72_v7 = vld [vmem:[#allocation7 + $0x38] sm:$0xff]  ;;  %v57_v10 = vld [vmem:[#allocation6] sm:$0xff]  ;;  %s112_s22 = sshll.u32 %s222_s2, 4  ;;  %s113_s22 = int_to_ptr.vmem [resolvable:$true] %s112_s22 }
  0x35   :  { %v58_v12 = vld [vmem:[#allocation6 + $0x8] sm:$0xff]  ;;  %v59_v16 = vld [vmem:[#allocation6 + $0x10] sm:$0xff]  ;;  %v60_v17 = vld [vmem:[#allocation6 + $0x18] sm:$0xff]  ;;  %s187_s23 = scalar_lea.vmem %s113_s22, 1024  ;;  %p192_p6 = scmp.lt.s32.totalorder %s113_s22, %s113_s22 }
  0x36   :  { %v61_v18 = vld [vmem:[#allocation6 + $0x20] sm:$0xff]  ;;  %v62_v27 = vld [vmem:[#allocation6 + $0x28] sm:$0xff]  ;;  %v63_v28 = vld [vmem:[#allocation6 + $0x30] sm:$0xff]  ;;  %p188_p5 = scmp.ne.s32.totalorder %s113_s22, %s187_s23  ;;  %p193_p7 = scmp.lt.s32.totalorder %s187_s23, %s187_s23 }
  0x37   :  { %v64_v29 = vld [vmem:[#allocation6 + $0x38] sm:$0xff] }
  0x38   :  { %s56_s21 = smul.f32 %s126_s20, %s54_s19  ;;  %v82_v9 = vstv %s54_s19  ;;  %p194_p8 = por %p193_p7, %p192_p6 }
  0x3a   :  { %v73_v8 = vstv %s56_s21  ;;  %p195_p9 = pnand %p194_p8, %p188_p5 }
  0x3b   :  { %v74_v11 = vmul.f32 %v73_v8, %v65_v0  ;;  %v75_v13 = vmul.f32 %v73_v8, %v66_v1  ;;  %v76_v14 = vmul.f32 %v73_v8, %v67_v2  ;;  %v77_v15 = vmul.f32 %v73_v8, %v68_v3 }
  0x3c   :  { %v78_v19 = vmul.f32 %v73_v8, %v69_v4  ;;  %v79_v20 = vmul.f32 %v73_v8, %v70_v5  ;;  %v80_v21 = vmul.f32 %v73_v8, %v71_v6  ;;  %v81_v22 = vmul.f32 %v73_v8, %v72_v7 }
  0x3d   :  { %v83_v23 = vsub.f32 %v82_v9, %v74_v11  ;;  %v84_v24 = vsub.f32 %v82_v9, %v75_v13  ;;  %v85_v25 = vsub.f32 %v82_v9, %v76_v14  ;;  %v86_v26 = vsub.f32 %v82_v9, %v77_v15 }
  0x3e   :  { %v87_v30 = vsub.f32 %v82_v9, %v78_v19  ;;  %v88_v31 = vsub.f32 %v82_v9, %v79_v20  ;;  %v89_v32 = vsub.f32 %v82_v9, %v80_v21  ;;  %v90_v33 = vsub.f32 %v82_v9, %v81_v22 }
  0x3f   :  { %v91_v34 = vmul.f32 %v83_v23, %v57_v10  ;;  %v92_v35 = vmul.f32 %v84_v24, %v58_v12  ;;  %v93_v36 = vmul.f32 %v85_v25, %v59_v16  ;;  %v94_v37 = vmul.f32 %v86_v26, %v60_v17 }
  0x40   :  { %v95_v38 = vmul.f32 %v87_v30, %v61_v18  ;;  %v96_v39 = vmul.f32 %v88_v31, %v62_v27  ;;  %v97_v40 = vmul.f32 %v89_v32, %v63_v28  ;;  %v98_v41 = vmul.f32 %v90_v33, %v64_v29 }
  0x41   :  { %99 = vst [vmem:[#allocation9] sm:$0xff] %v91_v34  ;;  %100 = vst [vmem:[#allocation9 + $0x8] sm:$0xff] %v92_v35 }
  0x42   :  { %101 = vst [vmem:[#allocation9 + $0x10] sm:$0xff] %v93_v36  ;;  %102 = vst [vmem:[#allocation9 + $0x18] sm:$0xff] %v94_v37 }
  0x43   :  { %103 = vst [vmem:[#allocation9 + $0x20] sm:$0xff] %v95_v38  ;;  %104 = vst [vmem:[#allocation9 + $0x28] sm:$0xff] %v96_v39 }
  0x44   :  { %105 = vst [vmem:[#allocation9 + $0x30] sm:$0xff] %v97_v40  ;;  %106 = vst [vmem:[#allocation9 + $0x38] sm:$0xff] %v98_v41 }
  0x45   :  { %198 = shalt.err (!%p195_p9)
}
  0x46   :  { %s199_s26 = scalar_lea.hbm %s303_s3, 1024 }
  0x47   :  { %p200_p10 = scmp.ne.s32.totalorder %s303_s3, %s199_s26  ;;  %p203_p11 = scmp.lt.u32.totalorder %s199_s26, %s303_s3 }
  0x49   :  { %p205_p12 = pnand %p203_p11, %p200_p10 }
  0x4b   :  { %208 = shalt.err (!%p205_p12)
}
  0x4c   :  { %118 = dma.vmem_to_hbm [thread:$0]  %s113_s22, 1024, %s303_s3, [#allocation4], %s219_s0, %s219_s0, %s220_s5  }
  0x4d   :  { %215 = dma.done.wait [#allocation4], 1024  }
  0x4e   :  { %216 = vsyncadd [#allocation4], 4294966272 }
  0x4f   :  { %122 = vsyncpa [#allocation3], 1 }
  0x50   :  { %123 = vsyncpa [#allocation8], 1 }
  0x51   :  { %124 = vsyncpa [#allocation4], 1 }
  0x52   :  { %125 = vsyncpa [#allocation5], 1 }

</bundles_post_ra>
